<compile_context>
chip_gen: v7x
topology: tpu7x:2x2x1
jax: 0.10.0
libtpu: 0.0.40
codegen_flags: <defaults>
</compile_context>

<pallas_src>
import jax
import jax.numpy as jnp
from jax.experimental import pallas as pl
from jax.experimental.pallas import tpu as pltpu

_LANES = 128


def _row_align(itemsize: int) -> int:
    # Minimum legal sublane tile for the block's second-to-last dim, per dtype packing.
    return {4: 8, 2: 16, 1: 32}.get(itemsize, 8)


def _num_tensorcores() -> int:
    # v7x exposes 2 TensorCores per device; v5e/v6e are single-TC.
    try:
        kind = jax.devices()[0].device_kind.lower()
    except Exception:
        return 1
    return 2 if ("7x" in kind or "v7" in kind) else 1


def _vmem_capacity_bytes() -> int:
    try:
        info = pltpu.get_tpu_info()
        cap = getattr(info, "vmem_capacity_bytes", None)
        if cap:
            return int(cap)
    except Exception:
        pass
    return 64 * 1024 * 1024  # conservative (v7x has the smallest VMEM)


def _make_kernel(R, rows_tile, n_inner, needs_mask):
    def kernel(ct_ref, mri_ref, sq_ct_ref, sq_mri_ref, dot_ref):
        p = pl.program_id(0)
        i = pl.program_id(1)

        # Output blocks are indexed only by p -> VMEM-resident across i; init at i == 0.
        @pl.when(i == 0)
        def _init():
            sq_ct_ref[...] = jnp.zeros_like(sq_ct_ref)
            sq_mri_ref[...] = jnp.zeros_like(sq_mri_ref)
            dot_ref[...] = jnp.zeros_like(dot_ref)

        ct = ct_ref[...].astype(jnp.float32)    # (B, rows_tile, 128), native dtype on the wire
        mri = mri_ref[...].astype(jnp.float32)  # (B, rows_tile, 128)

        if needs_mask:
            # Ragged row tail: zero rows whose *intended* global index is >= R.  The mask is
            # computed from program ids + static R, so it is correct even if the DMA for an
            # over-the-edge block was clamped to in-bounds data.
            row0 = (p * n_inner + i) * rows_tile
            rows = jax.lax.broadcasted_iota(jnp.int32, (1, rows_tile, 1), 1) + row0
            valid = rows < R
            ct = jnp.where(valid, ct, 0.0)
            mri = jnp.where(valid, mri, 0.0)

        # Reduce over the row (sublane) axis only; keep 128 lanes of f32 partials so the
        # cross-lane reduction is deferred to the tiny wrapper epilogue.
        sq_ct_ref[0] += jnp.sum(ct * ct, axis=1)     # (B, 128)
        sq_mri_ref[0] += jnp.sum(mri * mri, axis=1)  # (B, 128)
        dot_ref[0] += jnp.sum(ct * mri, axis=1)      # (B, 128)

    return kernel


def contrastive_loss(encoded_CT, encoded_MRI, is_same_class, threshold=100):
    """Pallas TPU contrastive / hinge-margin loss. Returns scalar f32."""
    B = encoded_CT.shape[0]

    # Keep the native dtype on the wire (no wrapper-side f32 upcast).
    ct2 = encoded_CT.reshape(B, -1)
    mri2 = encoded_MRI.reshape(B, -1)
    D = ct2.shape[1]
    itemsize = max(jnp.dtype(ct2.dtype).itemsize, jnp.dtype(mri2.dtype).itemsize)

    lanes_main = (D // _LANES) * _LANES
    rem = D - lanes_main

    if lanes_main == 0:
        # Degenerate: fewer than 128 features; nothing lane-dense to stream.
        return _reference_loss(encoded_CT, encoded_MRI, is_same_class, threshold)

    # Ragged lane tail (< 128 cols): tiny fused jnp reduction in the wrapper.
    if rem:
        ct_rem = ct2[:, lanes_main:].astype(jnp.float32)
        mri_rem = mri2[:, lanes_main:].astype(jnp.float32)
        sq_ct_rem = jnp.sum(ct_rem * ct_rem, axis=1)
        sq_mri_rem = jnp.sum(mri_rem * mri_rem, axis=1)
        dot_rem = jnp.sum(ct_rem * mri_rem, axis=1)
        # NOTE: the prefix slice below may materialize a copy; only hit when D % 128 != 0.
        ct_main, mri_main = ct2[:, :lanes_main], mri2[:, :lanes_main]
    else:
        sq_ct_rem = sq_mri_rem = dot_rem = jnp.zeros((B,), jnp.float32)
        ct_main, mri_main = ct2, mri2

    R = lanes_main // _LANES
    ct3 = ct_main.reshape(B, R, _LANES)    # free reshape (row-major split of last dim)
    mri3 = mri_main.reshape(B, R, _LANES)

    align = _row_align(itemsize)
    n_par = _num_tensorcores()
    if R < 2 * align:
        n_par = 1  # not enough rows to make a megacore split worthwhile

    # VMEM budget: scoped limit from the chip's capacity; inputs (2 arrays x 2 pipeline
    # buffers) get ~3/8 of it, leaving plenty of headroom for outputs / temporaries.
    phys = _vmem_capacity_bytes()
    scoped = min(phys // 2, 64 * 1024 * 1024)
    budget = (scoped * 3) // 8
    rows_cap = budget // (4 * B * _LANES * itemsize)
    rows_cap = (rows_cap // align) * align
    if rows_cap < align:
        # Extremely large batch: fall back to the minimum legal row tile and raise the
        # scoped limit to cover it (capped near physical VMEM).
        # TODO(synk): add a batch grid axis for batches too large for a single row tile.
        rows_cap = align
        needed = 4 * B * _LANES * align * itemsize + (4 << 20)
        scoped = max(scoped, min(needed, phys - (2 << 20)))

    rows_per_chunk = -(-R // n_par)
    rows_tile = min(rows_cap, -(-rows_per_chunk // align) * align)
    if n_par == 1 and R <= rows_cap:
        rows_tile = R  # single full-R block: no masking, no wasted DMA

    n_blocks = -(-R // rows_tile)
    n_inner = -(-n_blocks // n_par)
    needs_mask = (n_par * n_inner * rows_tile) != R

    if needs_mask:
        # Clamp so every DMA stays in-bounds; the in-kernel mask zeroes any re-read rows.
        in_map = lambda p, i: (0, jnp.minimum(p * n_inner + i, n_blocks - 1), 0)
    else:
        in_map = lambda p, i: (0, p * n_inner + i, 0)

    block = (B, rows_tile, _LANES)
    out_spec = pl.BlockSpec((1, B, _LANES), lambda p, i: (p, 0, 0))

    sq_ct, sq_mri, dot = pl.pallas_call(
        _make_kernel(R, rows_tile, n_inner, needs_mask),
        out_shape=(
            jax.ShapeDtypeStruct((n_par, B, _LANES), jnp.float32),
            jax.ShapeDtypeStruct((n_par, B, _LANES), jnp.float32),
            jax.ShapeDtypeStruct((n_par, B, _LANES), jnp.float32),
        ),
        grid_spec=pltpu.PrefetchScalarGridSpec(
            num_scalar_prefetch=0,
            grid=(n_par, n_inner),
            in_specs=[
                pl.BlockSpec(block, in_map),   # CT tile
                pl.BlockSpec(block, in_map),   # MRI tile
            ],
            out_specs=[out_spec, out_spec, out_spec],
        ),
        compiler_params=pltpu.CompilerParams(
            dimension_semantics=("parallel", "arbitrary"),
            vmem_limit_bytes=int(scoped)),
    )(ct3, mri3)

    # Tiny epilogue: cross-chunk + cross-lane reduction and loss combination.
    dis_ct = jnp.sum(sq_ct, axis=(0, 2)) + sq_ct_rem    # (B,)
    dis_mri = jnp.sum(sq_mri, axis=(0, 2)) + sq_mri_rem  # (B,)
    dot_v = jnp.sum(dot, axis=(0, 2)) + dot_rem           # (B,)
    # ||ct - mri||^2 via the dot identity; clamp at 0 against rounding when ct ~= mri.
    dis = jnp.maximum(dis_ct + dis_mri - 2.0 * dot_v, 0.0)

    same = is_same_class.astype(jnp.int32).astype(jnp.float32).reshape(B)
    per_sample = (
        same * dis
        + 2.0 * (1.0 - same) * jnp.maximum(float(threshold) - dis, 0.0)
        + jnp.maximum(25.0 - dis_ct, 0.0)
        + jnp.maximum(25.0 - dis_mri, 0.0)
    )
    return jnp.mean(per_sample)


def _reference_loss(encoded_CT, encoded_MRI, is_same_class, threshold=100):
    B = encoded_CT.shape[0]
    ct = encoded_CT.reshape(B, -1).astype(jnp.float32)
    mri = encoded_MRI.reshape(B, -1).astype(jnp.float32)
    same = is_same_class.astype(jnp.int32).astype(jnp.float32)
    dis_ct = jnp.sum(ct * ct, axis=1)
    dis_mri = jnp.sum(mri * mri, axis=1)
    dis = jnp.sum((ct - mri) ** 2, axis=1)
    loss = (same * dis
            + 2.0 * (1.0 - same) * jnp.maximum(float(threshold) - dis, 0.0)
            + jnp.maximum(25.0 - dis_ct, 0.0)
            + jnp.maximum(25.0 - dis_mri, 0.0))
    return jnp.mean(loss)


if __name__ == "__main__":
    key = jax.random.PRNGKey(0)
    k1, k2, k3 = jax.random.split(key, 3)

    B, C, H, W = 2, 4, 16, 16  # encoded feature maps, NCHW like torch
    encoded_CT = jax.random.normal(k1, (B, C, H, W), dtype=jnp.float32)
    encoded_MRI = jax.random.normal(k2, (B, C, H, W), dtype=jnp.float32)
    is_same_class = jax.random.bernoulli(k3, 0.5, (B,))

    # f32 path
    loss = contrastive_loss(encoded_CT, encoded_MRI, is_same_class, threshold=100)
    loss = jax.block_until_ready(loss)
    ref = _reference_loss(encoded_CT, encoded_MRI, is_same_class, threshold=100)
    assert jnp.allclose(loss, ref, rtol=1e-4, atol=1e-2), (loss, ref)

    # bf16-on-the-wire path (native dtype is DMA'd; cast to f32 happens in-kernel)
    ct_bf = encoded_CT.astype(jnp.bfloat16)
    mri_bf = encoded_MRI.astype(jnp.bfloat16)
    loss_bf = contrastive_loss(ct_bf, mri_bf, is_same_class, threshold=100)
    loss_bf = jax.block_until_ready(loss_bf)
    ref_bf = _reference_loss(ct_bf, mri_bf, is_same_class, threshold=100)
    assert jnp.allclose(loss_bf, ref_bf, rtol=1e-2, atol=1e-1), (loss_bf, ref_bf)

    print("KERNEL_OK")
</pallas_src>

<mosaic_0001>
module attributes {stable_mosaic.version = 11 : i64} {
  func.func @kernel(%arg0: i32, %arg1: i32, %arg2: memref<2x8x128xf32, #tpu.memory_space<vmem>>, %arg3: memref<2x8x128xf32, #tpu.memory_space<vmem>>, %arg4: memref<1x2x128xf32, #tpu.memory_space<vmem>>, %arg5: memref<1x2x128xf32, #tpu.memory_space<vmem>>, %arg6: memref<1x2x128xf32, #tpu.memory_space<vmem>>) attributes {dimension_semantics = [#tpu.dimension_semantics<parallel>, #tpu.dimension_semantics<arbitrary>], iteration_bounds = array<i64: 1, 1>, scalar_prefetch = 0 : i64, scratch_operands = 0 : i64, tpu.core_type = #tpu.core_type<tc>, window_params = [{transform_indices = @transform_0, window_bounds = array<i64: 2, 8, 128>}, {transform_indices = @transform_1, window_bounds = array<i64: 2, 8, 128>}, {transform_indices = @transform_2, window_bounds = array<i64: 1, 2, 128>}, {transform_indices = @transform_3, window_bounds = array<i64: 1, 2, 128>}, {transform_indices = @transform_4, window_bounds = array<i64: 1, 2, 128>}]} {
    %c0_i32 = arith.constant 0 : i32
    %0 = arith.cmpi eq, %arg1, %c0_i32 : i32
    %1 = arith.extui %0 : i1 to i32
    %c0_i32_0 = arith.constant 0 : i32
    %2 = arith.cmpi ne, %1, %c0_i32_0 : i32
    scf.if %2 {
      %cst_26 = arith.constant 0.000000e+00 : f32
      %29 = vector.broadcast %cst_26 : f32 to vector<1x2x128xf32>
      %c0_27 = arith.constant 0 : index
      %c0_28 = arith.constant 0 : index
      %c0_29 = arith.constant 0 : index
      %30 = vector.load %arg4[%c0_27, %c0_28, %c0_29] : memref<1x2x128xf32, #tpu.memory_space<vmem>>, vector<1x2x128xf32>
      tpu.vector_store %arg4[%c0_27, %c0_28, %c0_29], %29 {strides = array<i32>} : memref<1x2x128xf32, #tpu.memory_space<vmem>>, vector<1x2x128xf32>,
      %cst_30 = arith.constant 0.000000e+00 : f32
      %31 = vector.broadcast %cst_30 : f32 to vector<1x2x128xf32>
      %c0_31 = arith.constant 0 : index
      %c0_32 = arith.constant 0 : index
      %c0_33 = arith.constant 0 : index
      %32 = vector.load %arg5[%c0_31, %c0_32, %c0_33] : memref<1x2x128xf32, #tpu.memory_space<vmem>>, vector<1x2x128xf32>
      tpu.vector_store %arg5[%c0_31, %c0_32, %c0_33], %31 {strides = array<i32>} : memref<1x2x128xf32, #tpu.memory_space<vmem>>, vector<1x2x128xf32>,
      %cst_34 = arith.constant 0.000000e+00 : f32
      %33 = vector.broadcast %cst_34 : f32 to vector<1x2x128xf32>
      %c0_35 = arith.constant 0 : index
      %c0_36 = arith.constant 0 : index
      %c0_37 = arith.constant 0 : index
      %34 = vector.load %arg6[%c0_35, %c0_36, %c0_37] : memref<1x2x128xf32, #tpu.memory_space<vmem>>, vector<1x2x128xf32>
      tpu.vector_store %arg6[%c0_35, %c0_36, %c0_37], %33 {strides = array<i32>} : memref<1x2x128xf32, #tpu.memory_space<vmem>>, vector<1x2x128xf32>,
    } else {
    }
    %c0 = arith.constant 0 : index
    %c0_1 = arith.constant 0 : index
    %c0_2 = arith.constant 0 : index
    %3 = vector.load %arg2[%c0, %c0_1, %c0_2] : memref<2x8x128xf32, #tpu.memory_space<vmem>>, vector<2x8x128xf32>
    %c0_3 = arith.constant 0 : index
    %c0_4 = arith.constant 0 : index
    %c0_5 = arith.constant 0 : index
    %4 = vector.load %arg3[%c0_3, %c0_4, %c0_5] : memref<2x8x128xf32, #tpu.memory_space<vmem>>, vector<2x8x128xf32>
    %c0_6 = arith.constant 0 : index
    %c0_7 = arith.constant 0 : index
    %c0_8 = arith.constant 0 : index
    %5 = vector.load %arg4[%c0_6, %c0_7, %c0_8] : memref<1x2x128xf32, #tpu.memory_space<vmem>>, vector<1x2x128xf32>
    %6 = vector.shape_cast %5 : vector<1x2x128xf32> to vector<2x128xf32>
    %7 = arith.mulf %3, %3 : vector<2x8x128xf32>
    %cst = arith.constant dense<0.000000e+00> : vector<2x128xf32>
    %8 = vector.multi_reduction <add>, %7, %cst [1] : vector<2x8x128xf32> to vector<2x128xf32>
    %9 = arith.addf %6, %8 : vector<2x128xf32>
    %c0_9 = arith.constant 0 : index
    %c0_10 = arith.constant 0 : index
    %c0_11 = arith.constant 0 : index
    %10 = vector.load %arg4[%c0_9, %c0_10, %c0_11] : memref<1x2x128xf32, #tpu.memory_space<vmem>>, vector<1x2x128xf32>
    %11 = vector.shape_cast %10 : vector<1x2x128xf32> to vector<2x128xf32>
    %12 = vector.shape_cast %9 : vector<2x128xf32> to vector<1x2x128xf32>
    tpu.vector_store %arg4[%c0_9, %c0_10, %c0_11], %12 {strides = array<i32>} : memref<1x2x128xf32, #tpu.memory_space<vmem>>, vector<1x2x128xf32>,
    %c0_12 = arith.constant 0 : index
    %c0_13 = arith.constant 0 : index
    %c0_14 = arith.constant 0 : index
    %13 = vector.load %arg5[%c0_12, %c0_13, %c0_14] : memref<1x2x128xf32, #tpu.memory_space<vmem>>, vector<1x2x128xf32>
    %14 = vector.shape_cast %13 : vector<1x2x128xf32> to vector<2x128xf32>
    %15 = arith.mulf %4, %4 : vector<2x8x128xf32>
    %cst_15 = arith.constant dense<0.000000e+00> : vector<2x128xf32>
    %16 = vector.multi_reduction <add>, %15, %cst_15 [1] : vector<2x8x128xf32> to vector<2x128xf32>
    %17 = arith.addf %14, %16 : vector<2x128xf32>
    %c0_16 = arith.constant 0 : index
    %c0_17 = arith.constant 0 : index
    %c0_18 = arith.constant 0 : index
    %18 = vector.load %arg5[%c0_16, %c0_17, %c0_18] : memref<1x2x128xf32, #tpu.memory_space<vmem>>, vector<1x2x128xf32>
    %19 = vector.shape_cast %18 : vector<1x2x128xf32> to vector<2x128xf32>
    %20 = vector.shape_cast %17 : vector<2x128xf32> to vector<1x2x128xf32>
    tpu.vector_store %arg5[%c0_16, %c0_17, %c0_18], %20 {strides = array<i32>} : memref<1x2x128xf32, #tpu.memory_space<vmem>>, vector<1x2x128xf32>,
    %c0_19 = arith.constant 0 : index
    %c0_20 = arith.constant 0 : index
    %c0_21 = arith.constant 0 : index
    %21 = vector.load %arg6[%c0_19, %c0_20, %c0_21] : memref<1x2x128xf32, #tpu.memory_space<vmem>>, vector<1x2x128xf32>
    %22 = vector.shape_cast %21 : vector<1x2x128xf32> to vector<2x128xf32>
    %23 = arith.mulf %3, %4 : vector<2x8x128xf32>
    %cst_22 = arith.constant dense<0.000000e+00> : vector<2x128xf32>
    %24 = vector.multi_reduction <add>, %23, %cst_22 [1] : vector<2x8x128xf32> to vector<2x128xf32>
    %25 = arith.addf %22, %24 : vector<2x128xf32>
    %c0_23 = arith.constant 0 : index
    %c0_24 = arith.constant 0 : index
    %c0_25 = arith.constant 0 : index
    %26 = vector.load %arg6[%c0_23, %c0_24, %c0_25] : memref<1x2x128xf32, #tpu.memory_space<vmem>>, vector<1x2x128xf32>
    %27 = vector.shape_cast %26 : vector<1x2x128xf32> to vector<2x128xf32>
    %28 = vector.shape_cast %25 : vector<2x128xf32> to vector<1x2x128xf32>
    tpu.vector_store %arg6[%c0_23, %c0_24, %c0_25], %28 {strides = array<i32>} : memref<1x2x128xf32, #tpu.memory_space<vmem>>, vector<1x2x128xf32>,
    return
  }
  func.func @transform_0(%arg0: i32, %arg1: i32) -> (i32, i32, i32) {
    %c1_i32 = arith.constant 1 : i32
    %0 = arith.muli %arg0, %c1_i32 : i32
    %1 = arith.addi %0, %arg1 : i32
    %c0_i32 = arith.constant 0 : i32
    %c0_i32_0 = arith.constant 0 : i32
    %c0_i32_1 = arith.constant 0 : i32
    return %c0_i32, %1, %c0_i32_0 : i32, i32, i32
  }
  func.func @transform_1(%arg0: i32, %arg1: i32) -> (i32, i32, i32) {
    %c1_i32 = arith.constant 1 : i32
    %0 = arith.muli %arg0, %c1_i32 : i32
    %1 = arith.addi %0, %arg1 : i32
    %c0_i32 = arith.constant 0 : i32
    %c0_i32_0 = arith.constant 0 : i32
    %c0_i32_1 = arith.constant 0 : i32
    return %c0_i32, %1, %c0_i32_0 : i32, i32, i32
  }
  func.func @transform_2(%arg0: i32, %arg1: i32) -> (i32, i32, i32) {
    %c0_i32 = arith.constant 0 : i32
    %c0_i32_0 = arith.constant 0 : i32
    %c0_i32_1 = arith.constant 0 : i32
    return %arg0, %c0_i32, %c0_i32_0 : i32, i32, i32
  }
  func.func @transform_3(%arg0: i32, %arg1: i32) -> (i32, i32, i32) {
    %c0_i32 = arith.constant 0 : i32
    %c0_i32_0 = arith.constant 0 : i32
    %c0_i32_1 = arith.constant 0 : i32
    return %arg0, %c0_i32, %c0_i32_0 : i32, i32, i32
  }
  func.func @transform_4(%arg0: i32, %arg1: i32) -> (i32, i32, i32) {
    %c0_i32 = arith.constant 0 : i32
    %c0_i32_0 = arith.constant 0 : i32
    %c0_i32_1 = arith.constant 0 : i32
    return %arg0, %c0_i32, %c0_i32_0 : i32, i32, i32
  }
}

</mosaic_0001>

<bundles_post_ra>
// kernel: tpu_custom_call.1
= control target key start
LH: loop header
LB: loop body
LE: loop exit
PB: predicated region body
PF: predicated region fallthrough
CT: control target
= control target key end

     0   :  { %10 = vsyncpa [#allocation3], 0  ;;  %s406_s0 = inlined_call_operand.hbm [shape: f32[2,8,128], index: 0, kind: input, shape index: {}]   ;;  %s407_s1 = inlined_call_operand.hbm [shape: f32[2,8,128], index: 1, kind: input, shape index: {}]   ;;  %s408_s2 = inlined_call_operand.hbm [shape: f32[1,2,128], index: 2, kind: output, shape index: {0}]   ;;  %s409_s3 = inlined_call_operand.hbm [shape: f32[1,2,128], index: 3, kind: output, shape index: {1}]   ;;  %s410_s4 = inlined_call_operand.hbm [shape: f32[1,2,128], index: 4, kind: output, shape index: {2}]  }
   0x1   :  { %11 = vsyncpa [#allocation6], 0 }
   0x2   :  { %12 = vsyncpa [#allocation4], 0 }
   0x3   :  { %13 = vsyncpa [#allocation9], 0  ;;  %s296_s15 = smov [#allocation2]   ;;  %s178_s19 = scalar_lea.hbm %s406_s0, 256 }
   0x4   :  { %s22_s16 = sshll.u32 %s296_s15, 4  ;;  %p179_p0 = scmp.ne.s32.totalorder %s406_s0, %s178_s19  ;;  %s23_s16 = int_to_ptr.vmem [resolvable:$true] %s22_s16 }
   0x5   :  { %p182_p1 = scmp.lt.u32.totalorder %s178_s19, %s406_s0 }
   0x7   :  { %p184_p2 = pnand %p182_p1, %p179_p0 }
   0x9   :  { %187 = shalt.err (!%p184_p2)
}
   0xa   :  { %s188_s24 = scalar_lea.vmem %s23_s16, 256  ;;  %p193_p4 = scmp.lt.s32.totalorder %s23_s16, %s23_s16 }
   0xb   :  { %p189_p3 = scmp.ne.s32.totalorder %s23_s16, %s188_s24  ;;  %p194_p5 = scmp.lt.s32.totalorder %s188_s24, %s188_s24 }
   0xd   :  { %p195_p6 = por %p194_p5, %p193_p4 }
   0xf   :  { %p196_p7 = pnand %p195_p6, %p189_p3 }
  0x11   :  { %199 = shalt.err (!%p196_p7)
}
  0x12   :  { %s297_s25 = smov 128   ;;  %s298_s26 = smov 8  }
  0x13   :  { %28 = dma.hbm_to_vmem [thread:$0]  %s406_s0, 256, %s23_s16, [#allocation3], %s297_s25, %s297_s25, %s298_s26  }
  0x14   :  { %s299_s29 = smov [#allocation5]   ;;  %s200_s7 = scalar_lea.hbm %s407_s1, 256 }
  0x15   :  { %s37_s30 = sshll.u32 %s299_s29, 4  ;;  %p201_p8 = scmp.ne.s32.totalorder %s407_s1, %s200_s7  ;;  %s38_s30 = int_to_ptr.vmem [resolvable:$true] %s37_s30 }
  0x16   :  { %p204_p9 = scmp.lt.u32.totalorder %s200_s7, %s407_s1 }
  0x18   :  { %p206_p10 = pnand %p204_p9, %p201_p8 }
  0x1a   :  { %209 = shalt.err (!%p206_p10)
}
  0x1b   :  { %s210_s12 = scalar_lea.vmem %s38_s30, 256  ;;  %p215_p12 = scmp.lt.s32.totalorder %s38_s30, %s38_s30 }
  0x1c   :  { %p211_p11 = scmp.ne.s32.totalorder %s38_s30, %s210_s12  ;;  %p216_p13 = scmp.lt.s32.totalorder %s210_s12, %s210_s12 }
  0x1e   :  { %p217_p0 = por %p216_p13, %p215_p12 }
  0x20   :  { %p218_p1 = pnand %p217_p0, %p211_p11 }
  0x22   :  { %221 = shalt.err (!%p218_p1)
}
  0x23   :  { %43 = dma.hbm_to_vmem [thread:$0]  %s407_s1, 256, %s38_s30, [#allocation6], %s297_s25, %s297_s25, %s298_s26  }
  0x24   :  { %288 = dma.done.wait [#allocation3], 256  }
  0x25   :  { %289 = vsyncadd [#allocation3], 4294967040 }
  0x26   :  { %290 = dma.done.wait [#allocation6], 256  }
  0x27   :  { %291 = vsyncadd [#allocation6], 4294967040  ;;  %v300_v0 = vmov 0.0   ;;  %v61_v1 = vld [vmem:[#allocation5] sm:$0xff]  ;;  %v62_v2 = vld [vmem:[#allocation5 + $0x8] sm:$0xff]  ;;  %vm80_vm0 = vcmask 1041409  }
  0x28   :  { %57 = vst [vmem:[#allocation8] sm:$0x3] %v300_v0  ;;  %56 = vst [vmem:[#allocation7] sm:$0x3] %v300_v0  ;;  %v59_v3 = vld [vmem:[#allocation2] sm:$0xff]  ;;  %v86_v4 = vmul.f32 %v61_v1, %v61_v1  ;;  %v87_v5 = vmul.f32 %v62_v2, %v62_v2  ;;  %v60_v6 = vld [vmem:[#allocation2 + $0x8] sm:$0xff] }
  0x29   :  { %58 = vst [vmem:[#allocation10] sm:$0x3] %v300_v0  ;;  %v64_v7 = vmul.f32 %v59_v3, %v59_v3  ;;  %v107_v8 = vmul.f32 %v61_v1, %v59_v3  ;;  %v65_v9 = vmul.f32 %v60_v6, %v60_v6  ;;  %v108_v10 = vmul.f32 %v62_v2, %v60_v6  ;;  %s301_s1 = smov [#allocation8]   ;;  %s302_s15 = smov [#allocation7]  }
  0x2a   :  { %v88_v11 = vrot.slane %v86_v4, 4  ;;  %v94_v12 = vrot.slane %v87_v5, 4  ;;  %s143_s14 = sshll.u32 %s301_s1, 4  ;;  %s133_s16 = sshll.u32 %s302_s15, 4  ;;  %s144_s14 = int_to_ptr.vmem [resolvable:$true] %s143_s14  ;;  %s356_s16 = int_to_ptr.vmem [resolvable:$true] %s133_s16 }
  0x2b   :  { %v66_v13 = vrot.slane %v64_v7, 4  ;;  %v109_v14 = vrot.slane %v107_v8, 4  ;;  %v72_v15 = vrot.slane %v65_v9, 4  ;;  %v115_v16 = vrot.slane %v108_v10, 4  ;;  %s303_s17 = smov [#allocation10]   ;;  %s222_s19 = scalar_lea.vmem %s144_s14, 32 }
  0x2c   :  { %v89_v17 = vadd.f32 %v88_v11, %v86_v4  ;;  %v95_v18 = vadd.f32 %v94_v12, %v87_v5  ;;  %s153_s18 = sshll.u32 %s303_s17, 4  ;;  %p223_p2 = scmp.ne.s32.totalorder %s144_s14, %s222_s19  ;;  %s358_s18 = int_to_ptr.vmem [resolvable:$true] %s153_s18 }
  0x2d   :  { %v67_v19 = vadd.f32 %v66_v13, %v64_v7  ;;  %v110_v20 = vadd.f32 %v109_v14, %v107_v8  ;;  %v73_v21 = vadd.f32 %v72_v15, %v65_v9  ;;  %v116_v22 = vadd.f32 %v115_v16, %v108_v10  ;;  %p227_p3 = scmp.lt.s32.totalorder %s144_s14, %s144_s14  ;;  %p228_p4 = scmp.lt.s32.totalorder %s222_s19, %s222_s19 }
  0x2e   :  { %v90_v23 = vrot.slane %v89_v17, 2  ;;  %v96_v24 = vrot.slane %v95_v18, 2 }
  0x2f   :  { %v68_v25 = vrot.slane %v67_v19, 2  ;;  %v111_v26 = vrot.slane %v110_v20, 2  ;;  %v74_v27 = vrot.slane %v73_v21, 2  ;;  %v117_v28 = vrot.slane %v116_v22, 2  ;;  %v85_v41 = vld [vmem:[#allocation8] sm:$0x3]  ;;  %p229_p5 = por %p228_p4, %p227_p3 }
  0x30   :  { %v91_v29 = vadd.f32 %v90_v23, %v89_v17  ;;  %v97_v30 = vadd.f32 %v96_v24, %v95_v18  ;;  %v63_v46 = vld [vmem:[#allocation7] sm:$0x3]  ;;  %v106_v48 = vld [vmem:[#allocation10] sm:$0x3] }
  0x31   :  { %v69_v31 = vadd.f32 %v68_v25, %v67_v19  ;;  %v112_v32 = vadd.f32 %v111_v26, %v110_v20  ;;  %v75_v33 = vadd.f32 %v74_v27, %v73_v21  ;;  %v118_v34 = vadd.f32 %v117_v28, %v116_v22  ;;  %p230_p6 = pnand %p229_p5, %p223_p2 }
  0x32   :  { %v92_v35 = vrot.slane %v91_v29, 1  ;;  %v98_v36 = vrot.slane %v97_v30, 1 }
  0x33   :  { %v70_v37 = vrot.slane %v69_v31, 1  ;;  %v113_v38 = vrot.slane %v112_v32, 1  ;;  %v76_v39 = vrot.slane %v75_v33, 1  ;;  %v119_v40 = vrot.slane %v118_v34, 1 }
  0x34   :  { %v93_v42 = vadd.f32 %v92_v35, %v91_v29  ;;  %v99_v43 = vadd.f32 %v98_v36, %v97_v30 }
  0x35   :  { %v71_v44 = vadd.f32 %v70_v37, %v69_v31  ;;  %v114_v45 = vadd.f32 %v113_v38, %v112_v32  ;;  %v77_v47 = vadd.f32 %v76_v39, %v75_v33  ;;  %v120_v49 = vadd.f32 %v119_v40, %v118_v34 }
  0x36   :  { %v102_v50 = vsel %vm80_vm0, %v99_v43, %v93_v42 }
  0x37   :  { %v104_v51 = vadd.f32 %v102_v50, %v85_v41  ;;  %v81_v52 = vsel %vm80_vm0, %v77_v47, %v71_v44  ;;  %v123_v53 = vsel %vm80_vm0, %v120_v49, %v114_v45 }
  0x38   :  { %v83_v54 = vadd.f32 %v81_v52, %v63_v46  ;;  %v125_v55 = vadd.f32 %v123_v53, %v106_v48 }
  0x39   :  { %105 = vst [vmem:[#allocation8] sm:$0x3] %v104_v51 }
  0x3a   :  { %84 = vst [vmem:[#allocation7] sm:$0x3] %v83_v54  ;;  %126 = vst [vmem:[#allocation10] sm:$0x3] %v125_v55 }
  0x3b   :  { %233 = shalt.err (!%p230_p6)
}
  0x3c   :  { %s234_s22 = scalar_lea.hbm %s409_s3, 32 }
  0x3d   :  { %p235_p7 = scmp.ne.s32.totalorder %s409_s3, %s234_s22  ;;  %p238_p8 = scmp.lt.u32.totalorder %s234_s22, %s409_s3 }
  0x3f   :  { %p240_p9 = pnand %p238_p8, %p235_p7 }
  0x41   :  { %243 = shalt.err (!%p240_p9)
}
  0x42   :  { %146 = dma.vmem_to_hbm [thread:$0]  %s144_s14, 32, %s409_s3, [#allocation9]  }
  0x43   :  { %s244_s29 = scalar_lea.vmem %s356_s16, 32  ;;  %p249_p11 = scmp.lt.s32.totalorder %s356_s16, %s356_s16 }
  0x44   :  { %p245_p10 = scmp.ne.s32.totalorder %s356_s16, %s244_s29  ;;  %p250_p12 = scmp.lt.s32.totalorder %s244_s29, %s244_s29 }
  0x46   :  { %p251_p13 = por %p250_p12, %p249_p11 }
  0x48   :  { %p252_p0 = pnand %p251_p13, %p245_p10 }
  0x4a   :  { %255 = shalt.err (!%p252_p0)
}
  0x4b   :  { %s256_s6 = scalar_lea.hbm %s408_s2, 32 }
  0x4c   :  { %p257_p1 = scmp.ne.s32.totalorder %s408_s2, %s256_s6  ;;  %p260_p2 = scmp.lt.u32.totalorder %s256_s6, %s408_s2 }
  0x4e   :  { %p262_p3 = pnand %p260_p2, %p257_p1 }
  0x50   :  { %265 = shalt.err (!%p262_p3)
}
  0x51   :  { %136 = dma.vmem_to_hbm [thread:$0]  %s356_s16, 32, %s408_s2, [#allocation4]  }
  0x52   :  { %s266_s12 = scalar_lea.vmem %s358_s18, 32  ;;  %p271_p5 = scmp.lt.s32.totalorder %s358_s18, %s358_s18 }
  0x53   :  { %p267_p4 = scmp.ne.s32.totalorder %s358_s18, %s266_s12  ;;  %p272_p6 = scmp.lt.s32.totalorder %s266_s12, %s266_s12 }
  0x55   :  { %p273_p7 = por %p272_p6, %p271_p5 }
  0x57   :  { %p274_p8 = pnand %p273_p7, %p267_p4 }
  0x59   :  { %277 = shalt.err (!%p274_p8)
}
  0x5a   :  { %s278_s1 = scalar_lea.hbm %s410_s4, 32 }
  0x5b   :  { %p279_p9 = scmp.ne.s32.totalorder %s410_s4, %s278_s1  ;;  %p282_p10 = scmp.lt.u32.totalorder %s278_s1, %s410_s4 }
  0x5d   :  { %p284_p11 = pnand %p282_p10, %p279_p9 }
  0x5f   :  { %287 = shalt.err (!%p284_p11)
}
  0x60   :  { %156 = dma.vmem_to_hbm [thread:$0]  %s358_s18, 32, %s410_s4, [#allocation9]  }
  0x61   :  { %292 = dma.done.wait [#allocation4], 32  }
  0x62   :  { %293 = vsyncadd [#allocation4], 4294967264 }
  0x63   :  { %294 = dma.done.wait [#allocation9], 64  }
  0x64   :  { %295 = vsyncadd [#allocation9], 4294967232 }
  0x65   :  { %166 = vsyncpa [#allocation3], 1 }
  0x66   :  { %167 = vsyncpa [#allocation6], 1 }
  0x67   :  { %168 = vsyncpa [#allocation4], 1 }
  0x68   :  { %169 = vsyncpa [#allocation9], 1 }

</bundles_post_ra>
